<compile_context>
chip_gen: v6e
topology: v6e:2x2x1
jax: 0.10.0
libtpu: 0.0.40
codegen_flags: <defaults>
</compile_context>

<pallas_src>
import functools

import jax
import jax.numpy as jnp
from jax import lax
from jax.experimental import pallas as pl
from jax.experimental.pallas import tpu as pltpu


def _elu(x):
    # PyTorch-default ELU (alpha=1).  exp(x)-1 is used instead of expm1: the x>0
    # branch discards it (select lowering -> the inf from exp(+large) is dropped),
    # and for small negative x the absolute error is <1e-7, well below the f32
    # noise floor of the surrounding matmuls.  (expm1 Mosaic lowering is not
    # guaranteed on all generations.)
    return jnp.where(x > 0, x, jnp.exp(x) - 1.0)


def _mlp_zencoder_kernel(
    x_ref,                      # [TB, in_dim] f32  (natural layout, batch on sublanes)
    w0_ref, b0_ref,             # [hid, in]  f32, [hid, 1] f32
    w1_ref, b1_ref,             # [hid, hid] f32, [hid, 1] f32
    wh_ref, bh_ref,             # folded heads: [2*out, hid] f32, [2*out, 1] f32
    out_ref,                    # [2*out, TB] f32  (lane-dense, mean rows then cov rows)
    *, out_dim,
):
    # Layer 0: contract on in_dim (trans-b style) so the result is [hid, TB]
    # lane-dense without a wrapper-side transpose of x.
    h = lax.dot_general(
        w0_ref[...], x_ref[...],
        dimension_numbers=(((1,), (1,)), ((), ())),
        preferred_element_type=jnp.float32,
    ) + b0_ref[...]
    h = _elu(h)

    # Layer 1: Linear + ELU.
    h = jnp.dot(w1_ref[...], h, preferred_element_type=jnp.float32) + b1_ref[...]
    h = _elu(h)

    # Fused head (layer-2 Linear already folded into wh/bh in the wrapper):
    # rows [0, out_dim)      -> mean
    # rows [out_dim, 2*out)  -> cov pre-activation
    head = jnp.dot(wh_ref[...], h, preferred_element_type=jnp.float32) + bh_ref[...]

    # Apply the cov transform only to the lower rows via a sublane mask (no
    # sublane-boundary slicing assumptions on out_dim).
    row = lax.broadcasted_iota(jnp.int32, head.shape, 0)
    sig = 1.0 / (1.0 + jnp.exp(-head))
    out_ref[...] = jnp.where(row < out_dim, head, 0.1 + 0.9 * sig)


def _round_up(x, m):
    return (x + m - 1) // m * m


@functools.partial(jax.jit, static_argnames=("tb",))
def mlp_zencoder(x, params, *, tb=4096):
    """Forward pass of MLP_ZEncoder.

    x: [batch, in_dim] float32.
    params: dict with W stored as [in_features, out_features], b as [1, out_features].
    Returns (mean, cov), each [batch, out_dim] float32.
    """
    batch, in_dim = x.shape
    out_dim = params["wm"].shape[1]

    # ---- batch tiling ---------------------------------------------------------
    padded_min = _round_up(max(batch, 1), 128)
    tile = min(tb, padded_min)
    if tile == padded_min and padded_min >= 256:
        # Split into >=2 tiles so the "parallel" grid axis can shard across both
        # TensorCores on v7x (grid=1 would pin everything to a single TC).
        tile = _round_up((padded_min + 1) // 2, 128)
    padded = _round_up(batch, tile)
    grid = padded // tile

    f32 = jnp.float32

    # ---- wrapper-side weight prep (all in f32) --------------------------------
    w0 = params["w0"].T.astype(f32)                                  # [hid, in]
    w1 = params["w1"].T.astype(f32)                                  # [hid, hid]
    b0 = params["b0"].T.astype(f32)                                  # [hid, 1]
    b1 = params["b1"].T.astype(f32)                                  # [hid, 1]

    # Fold the activation-free third Linear (W2, b2) into the fused mean|cov head:
    #   h2 = h1 @ W2 + b2 ; head = h2 @ [Wm|Wc] + [bm|bc]
    #        = h1 @ (W2 @ [Wm|Wc]) + (b2 @ [Wm|Wc] + [bm|bc])
    whc = jnp.concatenate([params["wm"], params["wc"]], axis=1).astype(f32)  # [hid, 2*out]
    bhc = jnp.concatenate([params["bm"], params["bc"]], axis=1).astype(f32)  # [1, 2*out]
    wh = (params["w2"].astype(f32) @ whc).T                          # [2*out, hid]
    bh = (params["b2"].astype(f32) @ whc + bhc).T                    # [2*out, 1]

    # x stays in its natural [batch, in_dim] layout; only pad the batch dim.
    x_p = jnp.pad(x.astype(f32), ((0, padded - batch), (0, 0)))      # [padded, in]

    operands = (x_p, w0, b0, w1, b1, wh, bh)

    def resident(shape):     # weights/biases: full-array block, DMA'd once, stays in VMEM
        return pl.BlockSpec(shape, lambda i: (0, 0))

    in_specs = [
        pl.BlockSpec((tile, in_dim), lambda i: (i, 0)),   # x: grid walks the batch dim
        resident(w0.shape), resident(b0.shape),
        resident(w1.shape), resident(b1.shape),
        resident(wh.shape), resident(bh.shape),
    ]
    out_specs = pl.BlockSpec((2 * out_dim, tile), lambda i: (0, i))   # lane-dense fused output

    out_t = pl.pallas_call(
        functools.partial(_mlp_zencoder_kernel, out_dim=out_dim),
        out_shape=jax.ShapeDtypeStruct((2 * out_dim, padded), f32),
        grid=(grid,),
        in_specs=in_specs,
        out_specs=out_specs,
        compiler_params=pltpu.CompilerParams(
            dimension_semantics=("parallel",),   # shard batch tiles across TCs
        ),
    )(*operands)

    # Split fused output and return the module's [batch, out_dim] layout.
    mean = out_t[:out_dim, :batch].T
    cov = out_t[out_dim:, :batch].T
    return mean, cov


def init_params(key, in_dim, out_dim, hidden_dim=32):
    """nn.Linear-style init (uniform(-1/sqrt(fan_in), 1/sqrt(fan_in))).
    Weights stored as [in_features, out_features], biases as [1, out_features]."""
    def linear(k, fan_in, fan_out):
        kw, kb = jax.random.split(k)
        bound = 1.0 / jnp.sqrt(jnp.float32(fan_in))
        w = jax.random.uniform(kw, (fan_in, fan_out), jnp.float32, -bound, bound)
        b = jax.random.uniform(kb, (1, fan_out), jnp.float32, -bound, bound)
        return w, b

    keys = jax.random.split(key, 5)
    w0, b0 = linear(keys[0], in_dim, hidden_dim)
    w1, b1 = linear(keys[1], hidden_dim, hidden_dim)
    w2, b2 = linear(keys[2], hidden_dim, hidden_dim)
    wm, bm = linear(keys[3], hidden_dim, out_dim)
    wc, bc = linear(keys[4], hidden_dim, out_dim)
    return dict(w0=w0, b0=b0, w1=w1, b1=b1, w2=w2, b2=b2,
                wm=wm, bm=bm, wc=wc, bc=bc)


def reference_forward(x, p):
    """Pure-JAX f32 reference of the PyTorch module."""
    h = jax.nn.elu(x @ p["w0"] + p["b0"])
    h = jax.nn.elu(h @ p["w1"] + p["b1"])
    h = h @ p["w2"] + p["b2"]
    mean = h @ p["wm"] + p["bm"]
    cov = 0.1 + 0.9 * jax.nn.sigmoid(h @ p["wc"] + p["bc"])
    return mean, cov


if __name__ == "__main__":
    key = jax.random.PRNGKey(0)
    k_x, k_p, k_x2 = jax.random.split(key, 3)

    in_dim, out_dim, hidden_dim = 16, 8, 32
    params = init_params(k_p, in_dim, out_dim, hidden_dim)

    # Small batch (single 128-padded tile).
    batch = 8
    x = jax.random.normal(k_x, (batch, in_dim), jnp.float32)
    mean, cov = mlp_zencoder(x, params)
    jax.block_until_ready((mean, cov))
    assert mean.shape == (batch, out_dim) and cov.shape == (batch, out_dim)

    mean_ref, cov_ref = reference_forward(x, params)
    assert jnp.allclose(mean, mean_ref, atol=1e-4, rtol=1e-3), "mean mismatch (small batch)"
    assert jnp.allclose(cov, cov_ref, atol=1e-4, rtol=1e-3), "cov mismatch (small batch)"

    # Larger batch: exercises the multi-tile grid (pipelining / megacore path) and padding.
    batch_b = 1200
    x_b = jax.random.normal(k_x2, (batch_b, in_dim), jnp.float32)
    mean_b, cov_b = mlp_zencoder(x_b, params)
    jax.block_until_ready((mean_b, cov_b))
    assert mean_b.shape == (batch_b, out_dim) and cov_b.shape == (batch_b, out_dim)

    mean_bref, cov_bref = reference_forward(x_b, params)
    assert jnp.allclose(mean_b, mean_bref, atol=1e-4, rtol=1e-3), "mean mismatch (big batch)"
    assert jnp.allclose(cov_b, cov_bref, atol=1e-4, rtol=1e-3), "cov mismatch (big batch)"

    print("KERNEL_OK")
</pallas_src>

<mosaic_0001>
module attributes {stable_mosaic.version = 11 : i64} {
  func.func @_mlp_zencoder_kernel(%arg0: i32, %arg1: memref<128x16xf32, #tpu.memory_space<vmem>>, %arg2: memref<32x16xf32, #tpu.memory_space<vmem>>, %arg3: memref<32x1xf32, #tpu.memory_space<vmem>>, %arg4: memref<32x32xf32, #tpu.memory_space<vmem>>, %arg5: memref<32x1xf32, #tpu.memory_space<vmem>>, %arg6: memref<16x32xf32, #tpu.memory_space<vmem>>, %arg7: memref<16x1xf32, #tpu.memory_space<vmem>>, %arg8: memref<16x128xf32, #tpu.memory_space<vmem>>) attributes {dimension_semantics = [#tpu.dimension_semantics<parallel>], iteration_bounds = array<i64: 1>, scalar_prefetch = 0 : i64, scratch_operands = 0 : i64, tpu.core_type = #tpu.core_type<tc>, window_params = [{transform_indices = @transform_0, window_bounds = array<i64: 128, 16>}, {pipeline_mode = #tpu.pipeline_mode<synchronous>, transform_indices = @transform_1, window_bounds = array<i64: 32, 16>}, {pipeline_mode = #tpu.pipeline_mode<synchronous>, transform_indices = @transform_2, window_bounds = array<i64: 32, 1>}, {pipeline_mode = #tpu.pipeline_mode<synchronous>, transform_indices = @transform_3, window_bounds = array<i64: 32, 32>}, {pipeline_mode = #tpu.pipeline_mode<synchronous>, transform_indices = @transform_4, window_bounds = array<i64: 32, 1>}, {pipeline_mode = #tpu.pipeline_mode<synchronous>, transform_indices = @transform_5, window_bounds = array<i64: 16, 32>}, {pipeline_mode = #tpu.pipeline_mode<synchronous>, transform_indices = @transform_6, window_bounds = array<i64: 16, 1>}, {transform_indices = @transform_7, window_bounds = array<i64: 16, 128>}]} {
    %c0 = arith.constant 0 : index
    %c0_0 = arith.constant 0 : index
    %0 = vector.load %arg2[%c0, %c0_0] : memref<32x16xf32, #tpu.memory_space<vmem>>, vector<32x16xf32>
    %c0_1 = arith.constant 0 : index
    %c0_2 = arith.constant 0 : index
    %1 = vector.load %arg1[%c0_1, %c0_2] : memref<128x16xf32, #tpu.memory_space<vmem>>, vector<128x16xf32>
    %cst = arith.constant dense<0.000000e+00> : vector<32x128xf32>
    %2 = tpu.matmul %0, %1, %cst {dimension_numbers = #tpu.dot_dimension_numbers<[1], [1], [0], [0], [0, 0, 1, 0], [], []>} : vector<32x16xf32>, vector<128x16xf32>, vector<32x128xf32> -> vector<32x128xf32>
    %c0_3 = arith.constant 0 : index
    %c0_4 = arith.constant 0 : index
    %3 = vector.load %arg3[%c0_3, %c0_4] : memref<32x1xf32, #tpu.memory_space<vmem>>, vector<32x1xf32>
    %4 = vector.broadcast %3 : vector<32x1xf32> to vector<32x128xf32>
    %5 = arith.addf %2, %4 : vector<32x128xf32>
    %cst_5 = arith.constant 0.000000e+00 : f32
    %6 = vector.broadcast %cst_5 : f32 to vector<32x128xf32>
    %7 = arith.cmpf ogt, %5, %6 : vector<32x128xf32>
    %8 = math.exp %5 : vector<32x128xf32>
    %cst_6 = arith.constant 1.000000e+00 : f32
    %9 = vector.broadcast %cst_6 : f32 to vector<32x128xf32>
    %10 = arith.subf %8, %9 : vector<32x128xf32>
    %11 = arith.select %7, %5, %10 : vector<32x128xi1>, vector<32x128xf32>
    %c0_7 = arith.constant 0 : index
    %c0_8 = arith.constant 0 : index
    %12 = vector.load %arg4[%c0_7, %c0_8] : memref<32x32xf32, #tpu.memory_space<vmem>>, vector<32x32xf32>
    %cst_9 = arith.constant dense<0.000000e+00> : vector<32x128xf32>
    %13 = tpu.matmul %12, %11, %cst_9 {dimension_numbers = #tpu.dot_dimension_numbers<[1], [0], [0], [1], [0, 0, 1, 1], [], []>} : vector<32x32xf32>, vector<32x128xf32>, vector<32x128xf32> -> vector<32x128xf32>
    %c0_10 = arith.constant 0 : index
    %c0_11 = arith.constant 0 : index
    %14 = vector.load %arg5[%c0_10, %c0_11] : memref<32x1xf32, #tpu.memory_space<vmem>>, vector<32x1xf32>
    %15 = vector.broadcast %14 : vector<32x1xf32> to vector<32x128xf32>
    %16 = arith.addf %13, %15 : vector<32x128xf32>
    %cst_12 = arith.constant 0.000000e+00 : f32
    %17 = vector.broadcast %cst_12 : f32 to vector<32x128xf32>
    %18 = arith.cmpf ogt, %16, %17 : vector<32x128xf32>
    %19 = math.exp %16 : vector<32x128xf32>
    %cst_13 = arith.constant 1.000000e+00 : f32
    %20 = vector.broadcast %cst_13 : f32 to vector<32x128xf32>
    %21 = arith.subf %19, %20 : vector<32x128xf32>
    %22 = arith.select %18, %16, %21 : vector<32x128xi1>, vector<32x128xf32>
    %c0_14 = arith.constant 0 : index
    %c0_15 = arith.constant 0 : index
    %23 = vector.load %arg6[%c0_14, %c0_15] : memref<16x32xf32, #tpu.memory_space<vmem>>, vector<16x32xf32>
    %cst_16 = arith.constant dense<0.000000e+00> : vector<16x128xf32>
    %24 = tpu.matmul %23, %22, %cst_16 {dimension_numbers = #tpu.dot_dimension_numbers<[1], [0], [0], [1], [0, 0, 1, 1], [], []>} : vector<16x32xf32>, vector<32x128xf32>, vector<16x128xf32> -> vector<16x128xf32>
    %c0_17 = arith.constant 0 : index
    %c0_18 = arith.constant 0 : index
    %25 = vector.load %arg7[%c0_17, %c0_18] : memref<16x1xf32, #tpu.memory_space<vmem>>, vector<16x1xf32>
    %26 = vector.broadcast %25 : vector<16x1xf32> to vector<16x128xf32>
    %27 = arith.addf %24, %26 : vector<16x128xf32>
    %28 = tpu.iota {dimensions = array<i32: 0>} : vector<16x128xi32>
    %cst_19 = arith.constant 0.000000e+00 : f32
    %29 = vector.broadcast %cst_19 : f32 to vector<16x128xf32>
    %30 = arith.subf %29, %27 : vector<16x128xf32>
    %31 = math.exp %30 : vector<16x128xf32>
    %cst_20 = arith.constant 1.000000e+00 : f32
    %32 = vector.broadcast %cst_20 : f32 to vector<16x128xf32>
    %33 = arith.addf %32, %31 : vector<16x128xf32>
    %cst_21 = arith.constant 1.000000e+00 : f32
    %34 = vector.broadcast %cst_21 : f32 to vector<16x128xf32>
    %35 = arith.divf %34, %33 : vector<16x128xf32>
    %c8_i32 = arith.constant 8 : i32
    %36 = vector.broadcast %c8_i32 : i32 to vector<16x128xi32>
    %37 = arith.cmpi slt, %28, %36 : vector<16x128xi32>
    %cst_22 = arith.constant 0.899999976 : f32
    %38 = vector.broadcast %cst_22 : f32 to vector<16x128xf32>
    %39 = arith.mulf %38, %35 : vector<16x128xf32>
    %cst_23 = arith.constant 1.000000e-01 : f32
    %40 = vector.broadcast %cst_23 : f32 to vector<16x128xf32>
    %41 = arith.addf %40, %39 : vector<16x128xf32>
    %42 = arith.select %37, %27, %41 : vector<16x128xi1>, vector<16x128xf32>
    %c0_24 = arith.constant 0 : index
    %c0_25 = arith.constant 0 : index
    %43 = vector.load %arg8[%c0_24, %c0_25] : memref<16x128xf32, #tpu.memory_space<vmem>>, vector<16x128xf32>
    tpu.vector_store %arg8[%c0_24, %c0_25], %42 {strides = array<i32>} : memref<16x128xf32, #tpu.memory_space<vmem>>, vector<16x128xf32>,
    return
  }
  func.func @transform_0(%arg0: i32) -> (i32, i32) {
    %c0_i32 = arith.constant 0 : i32
    %c0_i32_0 = arith.constant 0 : i32
    return %arg0, %c0_i32 : i32, i32
  }
  func.func @transform_1(%arg0: i32) -> (i32, i32) {
    %c0_i32 = arith.constant 0 : i32
    %c0_i32_0 = arith.constant 0 : i32
    %c0_i32_1 = arith.constant 0 : i32
    return %c0_i32, %c0_i32_0 : i32, i32
  }
  func.func @transform_2(%arg0: i32) -> (i32, i32) {
    %c0_i32 = arith.constant 0 : i32
    %c0_i32_0 = arith.constant 0 : i32
    %c0_i32_1 = arith.constant 0 : i32
    return %c0_i32, %c0_i32_0 : i32, i32
  }
  func.func @transform_3(%arg0: i32) -> (i32, i32) {
    %c0_i32 = arith.constant 0 : i32
    %c0_i32_0 = arith.constant 0 : i32
    %c0_i32_1 = arith.constant 0 : i32
    return %c0_i32, %c0_i32_0 : i32, i32
  }
  func.func @transform_4(%arg0: i32) -> (i32, i32) {
    %c0_i32 = arith.constant 0 : i32
    %c0_i32_0 = arith.constant 0 : i32
    %c0_i32_1 = arith.constant 0 : i32
    return %c0_i32, %c0_i32_0 : i32, i32
  }
  func.func @transform_5(%arg0: i32) -> (i32, i32) {
    %c0_i32 = arith.constant 0 : i32
    %c0_i32_0 = arith.constant 0 : i32
    %c0_i32_1 = arith.constant 0 : i32
    return %c0_i32, %c0_i32_0 : i32, i32
  }
  func.func @transform_6(%arg0: i32) -> (i32, i32) {
    %c0_i32 = arith.constant 0 : i32
    %c0_i32_0 = arith.constant 0 : i32
    %c0_i32_1 = arith.constant 0 : i32
    return %c0_i32, %c0_i32_0 : i32, i32
  }
  func.func @transform_7(%arg0: i32) -> (i32, i32) {
    %c0_i32 = arith.constant 0 : i32
    %c0_i32_0 = arith.constant 0 : i32
    return %c0_i32, %arg0 : i32, i32
  }
}

</mosaic_0001>

<bundles_post_ra>
// kernel: mlp_zencoder.1
= control target key start
LH: loop header
LB: loop body
LE: loop exit
PB: predicated region body
PF: predicated region fallthrough
CT: control target
= control target key end

     0   :  { %vm70_vm0 = vcmask 130048   ;;  %v660_v2 = vmov 0   ;;  %vm264_vm1 = vcmask 261120   ;;  %s857_s0 = inlined_call_operand.vmem [shape: f32[128,16], index: 0, kind: input, shape index: {}]   ;;  %s858_s1 = inlined_call_operand.vmem [shape: f32[32,16], index: 1, kind: input, shape index: {}]   ;;  %s859_s2 = inlined_call_operand.vmem [shape: f32[32,1], index: 2, kind: input, shape index: {}]   ;;  %s860_s4 = inlined_call_operand.vmem [shape: f32[32,1], index: 4, kind: input, shape index: {}]   ;;  %s861_s6 = inlined_call_operand.vmem [shape: f32[16,1], index: 6, kind: input, shape index: {}]   ;;  %s862_s3 = inlined_call_operand.vmem [shape: f32[32,32], index: 3, kind: input, shape index: {}]   ;;  %s863_s5 = inlined_call_operand.vmem [shape: f32[16,32], index: 5, kind: input, shape index: {}]   ;;  %s864_s7 = inlined_call_operand.vmem [shape: f32[16,128], index: 7, kind: output, shape index: {}]  }
   0x1   :  { %v45_v0 = vld [vmem:[%s857_s0 + $0x78] sm:$0xff]  ;;  %v44_v1 = vld [vmem:[%s857_s0 + $0x70] sm:$0xff]  ;;  %638 = vset.pattern.permute.xlu0 %v660_v2  ;;  %639 = vset.pattern.permute.xlu1 %v660_v2  ;;  %v43_v3 = vld [vmem:[%s857_s0 + $0x68] sm:$0xff] }
   0x2   :  { %574 = vmatprep.subr.msk.mxu0 %vm70_vm0, %v45_v0  ;;  %v26_v4 = vld [vmem:[%s858_s1] sm:$0xff]  ;;  %v49_v5 = vld [vmem:[%s859_s2 + $0x18] sm:$0xff]  ;;  %v47_v6 = vld [vmem:[%s859_s2 + $0x8] sm:$0xff] }
   0x3   :  { %575 = vmatpush3.xpose.msk.msra.mxu0 %vm70_vm0, %v45_v0  ;;  %606 = vmatprep.mubr.msk.f32.mxu0 %vm70_vm0, %v26_v4  ;;  %v42_v7 = vld [vmem:[%s857_s0 + $0x60] sm:$0xff]  ;;  %v48_v8 = vld [vmem:[%s859_s2 + $0x10] sm:$0xff]  ;;  %v41_v10 = vld [vmem:[%s857_s0 + $0x58] sm:$0xff] }
   0x4   :  { %576 = vmatprep.subr.msk.mxu0 %vm70_vm0, %v44_v1  ;;  %67 = vperm.xlu0 %638, %v49_v5   ;;  %v46_v9 = vld [vmem:[%s859_s2] sm:$0xff]  ;;  %v243_v11 = vld [vmem:[%s860_s4 + $0x18] sm:$0xff]  ;;  %v242_v12 = vld [vmem:[%s860_s4 + $0x10] sm:$0xff] }
   0x5   :  { %57 = vperm.xlu1 %639, %v47_v6   ;;  %v40_v13 = vld [vmem:[%s857_s0 + $0x50] sm:$0xff]  ;;  %v241_v14 = vld [vmem:[%s860_s4 + $0x8] sm:$0xff]  ;;  %v240_v15 = vld [vmem:[%s860_s4] sm:$0xff] }
   0x6   :  { %v39_v16 = vld [vmem:[%s857_s0 + $0x48] sm:$0xff]  ;;  %v384_v18 = vld [vmem:[%s861_s6] sm:$0xff]  ;;  %v37_v20 = vld [vmem:[%s857_s0 + $0x38] sm:$0xff] }
   0x7   :  { %577 = vmatpush3.xpose.msk.msra.mxu0 %vm70_vm0, %v44_v1  ;;  %v385_v17 = vld [vmem:[%s861_s6 + $0x8] sm:$0xff]  ;;  %v38_v19 = vld [vmem:[%s857_s0 + $0x40] sm:$0xff]  ;;  %v36_v21 = vld [vmem:[%s857_s0 + $0x30] sm:$0xff] }
   0x8   :  { %578 = vmatprep.subr.msk.mxu0 %vm70_vm0, %v43_v3  ;;  %62 = vperm.xlu0 %638, %v48_v8   ;;  %v35_v22 = vld [vmem:[%s857_s0 + $0x28] sm:$0xff]  ;;  %v34_v23 = vld [vmem:[%s857_s0 + $0x20] sm:$0xff]  ;;  %v33_v24 = vld [vmem:[%s857_s0 + $0x18] sm:$0xff] }
   0x9   :  { %52 = vperm.xlu1 %639, %v46_v9   ;;  %v32_v25 = vld [vmem:[%s857_s0 + $0x10] sm:$0xff]  ;;  %v31_v26 = vld [vmem:[%s857_s0 + $0x8] sm:$0xff]  ;;  %v30_v27 = vld [vmem:[%s857_s0] sm:$0xff] }
   0xa   :  { %v27_v28 = vld [vmem:[%s858_s1 + $0x8] sm:$0xff]  ;;  %v28_v29 = vld [vmem:[%s858_s1 + $0x10] sm:$0xff]  ;;  %v29_v30 = vld [vmem:[%s858_s1 + $0x18] sm:$0xff] }
   0xb   :  { %579 = vmatpush3.xpose.msk.msra.mxu0 %vm70_vm0, %v43_v3  ;;  %v236_v31 = vld [vmem:[%s862_s3] sm:$0xff]  ;;  %v237_v60 = vld [vmem:[%s862_s3 + $0x8] sm:$0xff]  ;;  %v238_v61 = vld [vmem:[%s862_s3 + $0x10] sm:$0xff] }
   0xc   :  { %580 = vmatprep.subr.msk.mxu0 %vm70_vm0, %v42_v7  ;;  %261 = vperm.xlu0 %638, %v243_v11   ;;  %v239_v62 = vld [vmem:[%s862_s3 + $0x18] sm:$0xff]  ;;  %v382_v63 = vld [vmem:[%s863_s5] sm:$0xff] }
   0xd   :  { %256 = vperm.xlu1 %639, %v242_v12   ;;  %620 = vmatprep.mubr.msk.f32.mxu1 %vm264_vm1, %v236_v31 }
   0xf   :  { %581 = vmatpush3.xpose.msk.msra.mxu0 %vm70_vm0, %v42_v7 }
  0x10   :  { %582 = vmatprep.subr.msk.mxu0 %vm70_vm0, %v41_v10  ;;  %251 = vperm.xlu0 %638, %v241_v14  }
  0x11   :  { %246 = vperm.xlu1 %639, %v240_v15  }
  0x13   :  { %583 = vmatpush3.xpose.msk.msra.mxu0 %vm70_vm0, %v41_v10 }
  0x14   :  { %584 = vmatprep.subr.msk.mxu0 %vm70_vm0, %v40_v13  ;;  %393 = vperm.xlu0 %638, %v385_v17  }
  0x15   :  { %388 = vperm.xlu1 %639, %v384_v18  }
  0x17   :  { %585 = vmatpush3.xpose.msk.msra.mxu0 %vm70_vm0, %v40_v13 }
  0x18   :  { %586 = vmatprep.subr.msk.mxu0 %vm70_vm0, %v39_v16 }
  0x1b   :  { %587 = vmatpush3.xpose.msk.msra.mxu0 %vm70_vm0, %v39_v16 }
  0x1c   :  { %588 = vmatprep.subr.msk.mxu0 %vm70_vm0, %v38_v19 }
  0x1f   :  { %589 = vmatpush3.xpose.msk.msra.mxu0 %vm70_vm0, %v38_v19 }
  0x20   :  { %590 = vmatprep.subr.msk.mxu0 %vm70_vm0, %v37_v20 }
  0x23   :  { %591 = vmatpush3.xpose.msk.msra.mxu0 %vm70_vm0, %v37_v20 }
  0x24   :  { %592 = vmatprep.subr.msk.mxu0 %vm70_vm0, %v36_v21 }
  0x27   :  { %593 = vmatpush3.xpose.msk.msra.mxu0 %vm70_vm0, %v36_v21 }
  0x28   :  { %594 = vmatprep.subr.msk.mxu0 %vm70_vm0, %v35_v22 }
  0x2b   :  { %595 = vmatpush3.xpose.msk.msra.mxu0 %vm70_vm0, %v35_v22 }
  0x2c   :  { %596 = vmatprep.subr.msk.mxu0 %vm70_vm0, %v34_v23 }
  0x2f   :  { %597 = vmatpush3.xpose.msk.msra.mxu0 %vm70_vm0, %v34_v23 }
  0x30   :  { %598 = vmatprep.subr.msk.mxu0 %vm70_vm0, %v33_v24 }
  0x33   :  { %599 = vmatpush3.xpose.msk.msra.mxu0 %vm70_vm0, %v33_v24 }
  0x34   :  { %600 = vmatprep.subr.msk.mxu0 %vm70_vm0, %v32_v25 }
  0x37   :  { %601 = vmatpush3.xpose.msk.msra.mxu0 %vm70_vm0, %v32_v25 }
  0x38   :  { %602 = vmatprep.subr.msk.mxu0 %vm70_vm0, %v31_v26 }
  0x3b   :  { %603 = vmatpush3.xpose.msk.msra.mxu0 %vm70_vm0, %v31_v26 }
  0x3c   :  { %604 = vmatprep.subr.msk.mxu0 %vm70_vm0, %v30_v27 }
  0x3f   :  { %605 = vmatpush3.xpose.msk.msra.mxu0 %vm70_vm0, %v30_v27 }
  0x42   :  { %607 = vmatmul.mubr.msk.f32.vlgmr.msra.gmra.mxu0 %vm70_vm0, %v27_v28  ;;  %v383_v28 = vld [vmem:[%s863_s5 + $0x8] sm:$0xff] }
  0x43   :  { %609 = vmatprep.mubr.msk.f32.mxu0 %vm70_vm0, %v28_v29 }
  0x46   :  { %610 = vmatmul.mubr.msk.f32.gmra.mxu0 %vm70_vm0, %v29_v30 }
  0x7f   :  { %v68_v33 = vpop.permute.xlu0 %67 }
  0x80   :  { %v58_v32 = vpop.permute.xlu1 %57 }
  0x83   :  { %v63_v42 = vpop.permute.xlu0 %62 }
  0x84   :  { %v53_v36 = vpop.permute.xlu1 %52 }
  0x87   :  { %v262_v0 = vpop.permute.xlu0 %261 }
  0x88   :  { %v257_v1 = vpop.permute.xlu1 %256 }
  0x8b   :  { %v252_v2 = vpop.permute.xlu0 %251 }
  0x8c   :  { %v247_v5 = vpop.permute.xlu1 %246 }
  0x8f   :  { %v394_v29 = vpop.permute.xlu0 %393 }
 0x102   :  { %v608_v34 = vpop.f32.mrf.mxu0 }
 0x103   :  { %v203_v35 = vadd.f32 %v608_v34, %v58_v32  ;;  %v389_v32 = vpop.permute.xlu1 %388 }
 0x104   :  { %v197_v37 = vpop.f32.mrf.mxu0 }
 0x105   :  { %v198_v38 = vadd.f32 %v197_v37, %v53_v36  ;;  %v222_v39 = vmul.f32 1.442695, %v203_v35  ;;  %vm217_vm4 = vcmp.gt.f32.partialorder %v203_v35, 0.0 }
 0x106   :  { %v611_v40 = vpop.f32.mrf.mxu0 }
 0x107   :  { %v213_v41 = vadd.f32 %v611_v40, %v68_v33  ;;  %v220_v43 = vmul.f32 1.442695, %v198_v38  ;;  %640 = vpow2.f32 %v222_v39  ;;  %vm216_vm5 = vcmp.gt.f32.partialorder %v198_v38, 0.0 }
 0x108   :  { %v207_v44 = vpop.f32.mrf.mxu0 }
 0x109   :  { %v226_v45 = vmul.f32 1.442695, %v213_v41  ;;  %v208_v46 = vadd.f32 %v207_v44, %v63_v42  ;;  %vm219_vm2 = vcmp.gt.f32.partialorder %v213_v41, 0.0 }
 0x10b   :  { %642 = vpow2.f32 %v226_v45  ;;  %v224_v47 = vmul.f32 1.442695, %v208_v46  ;;  %vm218_vm3 = vcmp.gt.f32.partialorder %v208_v46, 0.0 }
 0x10c   :  { %644 = vpow2.f32 %v220_v43 }
 0x10d   :  { %646 = vpow2.f32 %v224_v47 }
 0x114   :  { %v641_v48 = vpop.eup %640 }
 0x115   :  { %v527_v55 = vadd.f32 -1.0, %v641_v48 }
 0x117   :  { %v233_v58 = vsel %vm217_vm4, %v203_v35, %v527_v55 }
 0x118   :  { %v643_v49 = vpop.eup %642 }
 0x119   :  { %v645_v50 = vpop.eup %644  ;;  %v529_v51 = vadd.f32 -1.0, %v643_v49 }
 0x11a   :  { %v647_v52 = vpop.eup %646  ;;  %v526_v57 = vadd.f32 -1.0, %v645_v50 }
 0x11b   :  { %v235_v53 = vsel %vm219_vm2, %v213_v41, %v529_v51  ;;  %v528_v54 = vadd.f32 -1.0, %v647_v52 }
 0x11c   :  { %612 = vmatprep.subr.mxu1 %v235_v53  ;;  %v232_v59 = vsel %vm216_vm5, %v198_v38, %v526_v57 }
 0x11d   :  { %613 = vmatpush3.msra.mxu1 %v235_v53  ;;  %v234_v56 = vsel %vm218_vm3, %v208_v46, %v528_v54 }
 0x11e   :  { %614 = vmatprep.subr.mxu1 %v234_v56 }
 0x11f   :  { %615 = vmatpush3.msra.mxu1 %v234_v56 }
 0x120   :  { %616 = vmatprep.subr.mxu1 %v233_v58 }
 0x121   :  { %617 = vmatpush3.msra.mxu1 %v233_v58 }
 0x122   :  { %618 = vmatprep.subr.mxu1 %v232_v59 }
 0x123   :  { %619 = vmatpush3.msra.mxu1 %v232_v59 }
 0x124   :  { %621 = vmatmul.mubr.msk.f32.vlgmr.msra.gmra.mxu1 %vm264_vm1, %v237_v60 }
 0x125   :  { %623 = vmatprep.mubr.msk.f32.mxu1 %vm264_vm1, %v238_v61 }
 0x128   :  { %624 = vmatmul.mubr.msk.f32.gmra.mxu1 %vm264_vm1, %v239_v62 }
 0x129   :  { %634 = vmatprep.mubr.msk.f32.mxu1 %vm264_vm1, %v382_v63 }
 0x1e4   :  { %v622_v3 = vpop.f32.mrf.mxu1 }
 0x1e5   :  { %v349_v4 = vadd.f32 %v622_v3, %v252_v2 }
 0x1e6   :  { %v343_v6 = vpop.f32.mrf.mxu1 }
 0x1e7   :  { %v344_v7 = vadd.f32 %v343_v6, %v247_v5  ;;  %v368_v8 = vmul.f32 1.442695, %v349_v4  ;;  %vm363_vm8 = vcmp.gt.f32.partialorder %v349_v4, 0.0 }
 0x1e8   :  { %v625_v9 = vpop.f32.mrf.mxu1 }
 0x1e9   :  { %v359_v10 = vadd.f32 %v625_v9, %v262_v0  ;;  %v366_v11 = vmul.f32 1.442695, %v344_v7  ;;  %648 = vpow2.f32 %v368_v8  ;;  %vm362_vm9 = vcmp.gt.f32.partialorder %v344_v7, 0.0 }
 0x1ea   :  { %v353_v12 = vpop.f32.mrf.mxu1 }
 0x1eb   :  { %v372_v13 = vmul.f32 1.442695, %v359_v10  ;;  %v354_v14 = vadd.f32 %v353_v12, %v257_v1  ;;  %vm365_vm6 = vcmp.gt.f32.partialorder %v359_v10, 0.0 }
 0x1ed   :  { %650 = vpow2.f32 %v372_v13  ;;  %v370_v15 = vmul.f32 1.442695, %v354_v14  ;;  %vm364_vm7 = vcmp.gt.f32.partialorder %v354_v14, 0.0 }
 0x1ee   :  { %652 = vpow2.f32 %v366_v11 }
 0x1ef   :  { %654 = vpow2.f32 %v370_v15 }
 0x1f6   :  { %v649_v16 = vpop.eup %648 }
 0x1f7   :  { %v535_v23 = vadd.f32 -1.0, %v649_v16 }
 0x1f9   :  { %v379_v26 = vsel %vm363_vm8, %v349_v4, %v535_v23 }
 0x1fa   :  { %v651_v17 = vpop.eup %650 }
 0x1fb   :  { %v653_v18 = vpop.eup %652  ;;  %v537_v19 = vadd.f32 -1.0, %v651_v17 }
 0x1fc   :  { %v655_v20 = vpop.eup %654  ;;  %v534_v25 = vadd.f32 -1.0, %v653_v18 }
 0x1fd   :  { %v381_v21 = vsel %vm365_vm6, %v359_v10, %v537_v19  ;;  %v536_v22 = vadd.f32 -1.0, %v655_v20 }
 0x1fe   :  { %626 = vmatprep.subr.mxu1 %v381_v21  ;;  %v378_v27 = vsel %vm362_vm9, %v344_v7, %v534_v25 }
 0x1ff   :  { %627 = vmatpush3.msra.mxu1 %v381_v21  ;;  %v380_v24 = vsel %vm364_vm7, %v354_v14, %v536_v22 }
 0x200   :  { %628 = vmatprep.subr.mxu1 %v380_v24 }
 0x201   :  { %629 = vmatpush3.msra.mxu1 %v380_v24 }
 0x202   :  { %630 = vmatprep.subr.mxu1 %v379_v26 }
 0x203   :  { %631 = vmatpush3.msra.mxu1 %v379_v26 }
 0x204   :  { %632 = vmatprep.subr.mxu1 %v378_v27 }
 0x205   :  { %633 = vmatpush3.msra.mxu1 %v378_v27 }
 0x206   :  { %635 = vmatmul.mubr.msk.f32.vlgmr.msra.gmra.mxu1 %vm264_vm1, %v383_v28 }
 0x2c6   :  { %v636_v30 = vpop.f32.mrf.mxu1 }
 0x2c7   :  { %v474_v31 = vadd.f32 %v636_v30, %v394_v29 }
 0x2c8   :  { %v468_v33 = vpop.f32.mrf.mxu1 }
 0x2c9   :  { %v481_v34 = vsub.f32 0.0, %v474_v31  ;;  %v469_v35 = vadd.f32 %v468_v33, %v389_v32 }
 0x2cb   :  { %v484_v36 = vmul.f32 1.442695, %v481_v34  ;;  %500 = vst [vmem:[%s864_s7] sm:$0xff] %v469_v35 }
 0x2cd   :  { %656 = vpow2.f32 %v484_v36 }
 0x2da   :  { %v657_v37 = vpop.eup %656 }
 0x2db   :  { %v487_v38 = vadd.f32 1.0, %v657_v37 }
 0x2dd   :  { %658 = vrcp.f32 %v487_v38 }
 0x2ea   :  { %v659_v39 = vpop.eup %658 }
 0x2eb   :  { %v495_v40 = vmul.f32 0.9, %v659_v39 }
 0x2ed   :  { %v497_v41 = vadd.f32 0.1, %v495_v40 }
 0x2ef   :  { %501 = vst [vmem:[%s864_s7 + $0x8] sm:$0xff] %v497_v41 }

</bundles_post_ra>
